<compile_context>
chip_gen: v7x
topology: tpu7x:2x2x1
jax: 0.10.0
libtpu: 0.0.40
codegen_flags: <defaults>
</compile_context>

<pallas_src>
import functools

import numpy as np
import jax
import jax.numpy as jnp
from jax import lax
from jax.experimental import pallas as pl
from jax.experimental.pallas import tpu as pltpu

K_SIZE = 4   # ConvBlock kernel size
STRIDE = 2   # ConvBlock stride


def _encoder_block_cfgs(depth, ch, max_channels, h, w):
    """Per-block config following ConvEncoder.__init__ channel / padding logic."""
    chans = [(4, ch), (ch, ch)]
    in_c, out_c = ch, ch
    for block_i in range(2, depth):
        if block_i % 2:
            in_c = out_c
        else:
            in_c, out_c = out_c, min(2 * out_c, max_channels)
        chans.append((in_c, out_c))
    cfgs = []
    cur_h, cur_w = h, w
    for block_i, (cin, cout) in enumerate(chans):
        pad = 1 if block_i < 2 else int(block_i < depth - 1)
        hp, wp = cur_h + 2 * pad, cur_w + 2 * pad
        ho = (hp - K_SIZE) // STRIDE + 1
        wo = (wp - K_SIZE) // STRIDE + 1
        cfgs.append(dict(cin=cin, cout=cout, pad=pad, hp=hp, wp=wp, ho=ho, wo=wo))
        cur_h, cur_w = ho, wo
    return cfgs


def _toeplitz_weight(w_oihw, wp, wo):
    """Pack (Cout, Cin, kh, kw) into a row-Toeplitz matmul weight (kh*wp*Cin, wo*Cout).

    Row index = (ky*wp + wpad)*Cin + c ; col index = wo_idx*Cout + co.
    Entry = W[co, c, ky, wpad - 2*wo_idx] when 0 <= wpad - 2*wo_idx < kw else 0.
    """
    cout, cin, kh, kw = w_oihw.shape
    w_khwc = jnp.transpose(w_oihw, (2, 3, 1, 0))           # (ky, kx, cin, cout)
    sel = np.zeros((wp, kw, wo), np.float32)
    for o in range(wo):
        for kx in range(kw):
            sel[STRIDE * o + kx, kx, o] = 1.0
    t = jnp.einsum("pxw,yxcd->ypcwd", jnp.asarray(sel), w_khwc)
    return t.reshape(kh * wp * cin, wo * cout)


def _build_fused_kernel(cfgs):
    """Whole encoder in one kernel body; everything unrolled at trace time."""
    nb = len(cfgs)
    k = K_SIZE

    def kernel(*refs):
        buf0 = refs[0]                                     # (2, 1, hp0//2, wp0*cin0)
        w_refs = [refs[1 + 2 * i] for i in range(nb)]
        b_refs = [refs[2 + 2 * i] for i in range(nb)]
        out_refs = list(refs[1 + 2 * nb:1 + 3 * nb])
        scratch = list(refs[1 + 3 * nb:])
        prow_refs = scratch[:nb]                           # per-block im2col matrices
        ibuf_refs = scratch[nb:]                           # inter-block padded inputs

        for bi, cfg in enumerate(cfgs):
            cin, cout = cfg["cin"], cfg["cout"]
            hp, wp, ho, wo = cfg["hp"], cfg["wp"], cfg["ho"], cfg["wo"]
            wpc = wp * cin
            prow = prow_refs[bi]

            # ---- im2col: one wide contiguous slab copy per kernel row (4 total) ----
            for ky in range(k):
                par, hb = ky % 2, ky // 2
                if bi == 0:
                    slab = buf0[par, 0, hb:hb + ho, :]                 # (ho, wp*cin)
                else:
                    slab = ibuf_refs[bi - 1][par, hb:hb + ho, :]       # (ho, wp*cin)
                prow[:, ky * wpc:(ky + 1) * wpc] = slab

            # ---- single MXU matmul per block (Toeplitz weights), bias + ELU fused ----
            acc = jnp.dot(prow[...], w_refs[bi][...],
                          preferred_element_type=jnp.float32)          # (ho, wo*cout)
            acc = acc + b_refs[bi][...]
            y = jnp.where(acc > 0.0, acc, jnp.exp(jnp.minimum(acc, 0.0)) - 1.0)

            # ---- lane-dense output store: one store per block ----
            out_refs[bi][0, :, :] = y.astype(out_refs[bi].dtype)

            # ---- chain into next block's H-parity-split / W-flattened input ----
            if bi + 1 < nb:
                nxt = cfgs[bi + 1]
                pnx = nxt["pad"]
                nbuf = ibuf_refs[bi]                       # (2, nxt_hp//2, nxt_wp*cout)
                h2n = nxt["hp"] // 2
                lanes = nxt["wp"] * cout
                lo = pnx * cout                            # lane offset of real data
                width = wo * cout

                if pnx:
                    # zero ONLY the padding ring (2 pad rows + left/right pad lanes)
                    nbuf[0, 0:1, :] = jnp.zeros((1, lanes), jnp.float32)
                    nbuf[1, h2n - 1:h2n, :] = jnp.zeros((1, lanes), jnp.float32)
                    nbuf[:, :, 0:lo] = jnp.zeros((2, h2n, lo), jnp.float32)
                    nbuf[:, :, lo + width:lanes] = jnp.zeros(
                        (2, h2n, lanes - lo - width), jnp.float32)

                # split output rows by H-parity of the next (padded) frame and store
                # each parity class with one contiguous wide store
                rows = {0: [], 1: []}
                for r in range(ho):
                    hpad = r + pnx
                    rows[hpad % 2].append((hpad // 2, r))
                for par in (0, 1):
                    lst = rows[par]
                    if not lst:
                        continue
                    vals = jnp.concatenate([y[r:r + 1, :] for _, r in lst], axis=0)
                    h2_0 = lst[0][0]
                    nbuf[par, h2_0:h2_0 + len(lst), lo:lo + width] = \
                        vals.astype(nbuf.dtype)

    return kernel


@functools.partial(jax.jit, static_argnums=(2, 3, 4))
def conv_encoder_forward(x_nchw, params, depth, ch, max_channels):
    """Matches ConvEncoder.forward(x, backbone_features=None) with backbone_from=-1."""
    # TODO(synk): FeaturesConnector / backbone branch and norm layers not implemented
    # (this config has backbone_from=-1 and batchnorm_from=-1, so they are unused).
    n, _, h, w = x_nchw.shape
    cfgs = _encoder_block_cfgs(depth, ch, max_channels, h, w)
    nb = len(cfgs)
    assert len(params) == nb

    # -------- boundary layout glue (tiny, XLA): NCHW -> padded, H-parity split,
    # (W, C) flattened into the lane axis --------
    c0 = cfgs[0]
    p0 = c0["pad"]
    x_nhwc = jnp.transpose(x_nchw, (0, 2, 3, 1)).astype(jnp.float32)
    xp = jnp.pad(x_nhwc, ((0, 0), (p0, p0), (p0, p0), (0, 0)))
    buf0 = xp.reshape(n, c0["hp"] // 2, 2, c0["wp"] * c0["cin"]).transpose(2, 0, 1, 3)

    flat_inputs = [buf0]
    in_specs = [pl.BlockSpec((2, 1, c0["hp"] // 2, c0["wp"] * c0["cin"]),
                             lambda i: (0, i, 0, 0))]
    for cfg, (w_oihw, bias) in zip(cfgs, params):
        wt = _toeplitz_weight(w_oihw, cfg["wp"], cfg["wo"])
        brow = jnp.tile(bias, cfg["wo"]).reshape(1, cfg["wo"] * cfg["cout"])
        flat_inputs += [wt, brow]
        in_specs += [pl.BlockSpec(wt.shape, lambda i: (0, 0)),
                     pl.BlockSpec(brow.shape, lambda i: (0, 0))]

    out_shapes, out_specs = [], []
    for cfg in cfgs:
        shp = (n, cfg["ho"], cfg["wo"] * cfg["cout"])
        out_shapes.append(jax.ShapeDtypeStruct(shp, x_nchw.dtype))
        out_specs.append(pl.BlockSpec((1, cfg["ho"], cfg["wo"] * cfg["cout"]),
                                      lambda i: (i, 0, 0)))

    scratch_shapes = []
    for cfg in cfgs:   # per-block im2col matrices (M = Ho per grid step)
        scratch_shapes.append(
            pltpu.VMEM((cfg["ho"], K_SIZE * cfg["wp"] * cfg["cin"]), jnp.float32))
    for cfg in cfgs[1:]:   # inter-block parity-split padded inputs (stay in VMEM)
        scratch_shapes.append(
            pltpu.VMEM((2, cfg["hp"] // 2, cfg["wp"] * cfg["cin"]), jnp.float32))

    outs = pl.pallas_call(
        _build_fused_kernel(cfgs),
        out_shape=tuple(out_shapes),
        grid=(n,),
        in_specs=in_specs,
        out_specs=tuple(out_specs),
        scratch_shapes=scratch_shapes,
        compiler_params=pltpu.CompilerParams(dimension_semantics=("parallel",)),
    )(*flat_inputs)

    # Boundary layout: back to NCHW; deepest output first (= ConvEncoder outputs[::-1]).
    results = []
    for cfg, o in zip(cfgs, outs):
        y = o.reshape(n, cfg["ho"], cfg["wo"], cfg["cout"]).transpose(0, 3, 1, 2)
        results.append(y)
    return results[::-1]


def make_conv_encoder_params(key, depth, ch, max_channels):
    """Deterministic synthetic params; shapes follow ConvEncoder.__init__ channel logic."""
    specs = [(4, ch), (ch, ch)]
    in_c, out_c = ch, ch
    for block_i in range(2, depth):
        if block_i % 2:
            in_c = out_c
        else:
            in_c, out_c = out_c, min(2 * out_c, max_channels)
        specs.append((in_c, out_c))
    params = []
    for cin, cout in specs:
        key, kw, kb = jax.random.split(key, 3)
        scale = 1.0 / float(cin * 16) ** 0.5
        w = jax.random.uniform(kw, (cout, cin, 4, 4), jnp.float32, -scale, scale)
        b = jax.random.uniform(kb, (cout,), jnp.float32, -scale, scale)
        params.append((w, b))
    return params


def _conv_block_ref(x_nchw, w, b, padding):
    y = lax.conv_general_dilated(
        x_nchw, w, window_strides=(2, 2),
        padding=[(padding, padding), (padding, padding)],
        dimension_numbers=("NCHW", "OIHW", "NCHW"),
    )
    y = y + b.reshape(1, -1, 1, 1)
    return jnp.where(y > 0.0, y, jnp.exp(jnp.minimum(y, 0.0)) - 1.0)


if __name__ == "__main__":
    depth, ch, max_channels = 3, 8, 32
    key = jax.random.PRNGKey(0)
    kx_, kp_ = jax.random.split(key)
    x = jax.random.normal(kx_, (2, 4, 16, 16), jnp.float32)
    params = make_conv_encoder_params(kp_, depth, ch, max_channels)

    outs = conv_encoder_forward(x, params, depth, ch, max_channels)
    outs = jax.block_until_ready(outs)

    # Pure-JAX reference check of the full forward pass.
    xr = x
    refs_ = []
    for block_i, (w_, b_) in enumerate(params):
        pad = 1 if block_i < 2 else int(block_i < depth - 1)
        xr = _conv_block_ref(xr, w_, b_, pad)
        refs_.append(xr)
    refs_ = refs_[::-1]
    assert len(outs) == len(refs_) == depth
    for o, r in zip(outs, refs_):
        assert o.shape == r.shape, (o.shape, r.shape)
        assert float(jnp.max(jnp.abs(o - r))) < 1e-4

    print("KERNEL_OK")
</pallas_src>

<mosaic_0001>
module attributes {stable_mosaic.version = 11 : i64} {
  func.func @kernel(%arg0: i32, %arg1: memref<2x1x9x72xf32, #tpu.memory_space<vmem>>, %arg2: memref<288x64xf32, #tpu.memory_space<vmem>>, %arg3: memref<1x64xf32, #tpu.memory_space<vmem>>, %arg4: memref<320x32xf32, #tpu.memory_space<vmem>>, %arg5: memref<1x32xf32, #tpu.memory_space<vmem>>, %arg6: memref<128x16xf32, #tpu.memory_space<vmem>>, %arg7: memref<1x16xf32, #tpu.memory_space<vmem>>, %arg8: memref<1x8x64xf32, #tpu.memory_space<vmem>>, %arg9: memref<1x4x32xf32, #tpu.memory_space<vmem>>, %arg10: memref<1x1x16xf32, #tpu.memory_space<vmem>>, %arg11: memref<8x288xf32, #tpu.memory_space<vmem>>, %arg12: memref<4x320xf32, #tpu.memory_space<vmem>>, %arg13: memref<1x128xf32, #tpu.memory_space<vmem>>, %arg14: memref<2x5x80xf32, #tpu.memory_space<vmem>>, %arg15: memref<2x2x32xf32, #tpu.memory_space<vmem>>) attributes {dimension_semantics = [#tpu.dimension_semantics<parallel>], iteration_bounds = array<i64: 2>, scalar_prefetch = 0 : i64, scratch_operands = 5 : i64, tpu.core_type = #tpu.core_type<tc>, window_params = [{transform_indices = @transform_0, window_bounds = array<i64: 2, 1, 9, 72>}, {pipeline_mode = #tpu.pipeline_mode<synchronous>, transform_indices = @transform_1, window_bounds = array<i64: 288, 64>}, {pipeline_mode = #tpu.pipeline_mode<synchronous>, transform_indices = @transform_2, window_bounds = array<i64: 1, 64>}, {pipeline_mode = #tpu.pipeline_mode<synchronous>, transform_indices = @transform_3, window_bounds = array<i64: 320, 32>}, {pipeline_mode = #tpu.pipeline_mode<synchronous>, transform_indices = @transform_4, window_bounds = array<i64: 1, 32>}, {pipeline_mode = #tpu.pipeline_mode<synchronous>, transform_indices = @transform_5, window_bounds = array<i64: 128, 16>}, {pipeline_mode = #tpu.pipeline_mode<synchronous>, transform_indices = @transform_6, window_bounds = array<i64: 1, 16>}, {transform_indices = @transform_7, window_bounds = array<i64: 1, 8, 64>}, {transform_indices = @transform_8, window_bounds = array<i64: 1, 4, 32>}, {transform_indices = @transform_9, window_bounds = array<i64: 1, 1, 16>}]} {
    %c0 = arith.constant 0 : index
    %c0_0 = arith.constant 0 : index
    %c0_1 = arith.constant 0 : index
    %c0_2 = arith.constant 0 : index
    %0 = vector.load %arg1[%c0, %c0_0, %c0_1, %c0_2] : memref<2x1x9x72xf32, #tpu.memory_space<vmem>>, vector<1x1x8x72xf32>
    %1 = vector.shape_cast %0 : vector<1x1x8x72xf32> to vector<8x72xf32>
    %c0_3 = arith.constant 0 : index
    %c0_4 = arith.constant 0 : index
    %2 = vector.load %arg11[%c0_3, %c0_4] : memref<8x288xf32, #tpu.memory_space<vmem>>, vector<8x72xf32>
    tpu.vector_store %arg11[%c0_3, %c0_4], %1 {strides = array<i32>} : memref<8x288xf32, #tpu.memory_space<vmem>>, vector<8x72xf32>,
    %c1 = arith.constant 1 : index
    %c0_5 = arith.constant 0 : index
    %c0_6 = arith.constant 0 : index
    %c0_7 = arith.constant 0 : index
    %3 = vector.load %arg1[%c1, %c0_5, %c0_6, %c0_7] : memref<2x1x9x72xf32, #tpu.memory_space<vmem>>, vector<1x1x8x72xf32>
    %4 = vector.shape_cast %3 : vector<1x1x8x72xf32> to vector<8x72xf32>
    %c0_8 = arith.constant 0 : index
    %c72 = arith.constant 72 : index
    %5 = vector.load %arg11[%c0_8, %c72] : memref<8x288xf32, #tpu.memory_space<vmem>>, vector<8x72xf32>
    tpu.vector_store %arg11[%c0_8, %c72], %4 {strides = array<i32>} : memref<8x288xf32, #tpu.memory_space<vmem>>, vector<8x72xf32>,
    %c0_9 = arith.constant 0 : index
    %c0_10 = arith.constant 0 : index
    %c1_11 = arith.constant 1 : index
    %c0_12 = arith.constant 0 : index
    %6 = vector.load %arg1[%c0_9, %c0_10, %c1_11, %c0_12] : memref<2x1x9x72xf32, #tpu.memory_space<vmem>>, vector<1x1x8x72xf32>
    %7 = vector.shape_cast %6 : vector<1x1x8x72xf32> to vector<8x72xf32>
    %c0_13 = arith.constant 0 : index
    %c144 = arith.constant 144 : index
    %8 = vector.load %arg11[%c0_13, %c144] : memref<8x288xf32, #tpu.memory_space<vmem>>, vector<8x72xf32>
    tpu.vector_store %arg11[%c0_13, %c144], %7 {strides = array<i32>} : memref<8x288xf32, #tpu.memory_space<vmem>>, vector<8x72xf32>,
    %c1_14 = arith.constant 1 : index
    %c0_15 = arith.constant 0 : index
    %c1_16 = arith.constant 1 : index
    %c0_17 = arith.constant 0 : index
    %9 = vector.load %arg1[%c1_14, %c0_15, %c1_16, %c0_17] : memref<2x1x9x72xf32, #tpu.memory_space<vmem>>, vector<1x1x8x72xf32>
    %10 = vector.shape_cast %9 : vector<1x1x8x72xf32> to vector<8x72xf32>
    %c0_18 = arith.constant 0 : index
    %c216 = arith.constant 216 : index
    %11 = vector.load %arg11[%c0_18, %c216] : memref<8x288xf32, #tpu.memory_space<vmem>>, vector<8x72xf32>
    tpu.vector_store %arg11[%c0_18, %c216], %10 {strides = array<i32>} : memref<8x288xf32, #tpu.memory_space<vmem>>, vector<8x72xf32>,
    %c0_19 = arith.constant 0 : index
    %c0_20 = arith.constant 0 : index
    %12 = vector.load %arg11[%c0_19, %c0_20] : memref<8x288xf32, #tpu.memory_space<vmem>>, vector<8x288xf32>
    %c0_21 = arith.constant 0 : index
    %c0_22 = arith.constant 0 : index
    %13 = vector.load %arg2[%c0_21, %c0_22] : memref<288x64xf32, #tpu.memory_space<vmem>>, vector<288x64xf32>
    %cst = arith.constant dense<0.000000e+00> : vector<8x64xf32>
    %14 = tpu.matmul %12, %13, %cst {dimension_numbers = #tpu.dot_dimension_numbers<[1], [0], [0], [1], [0, 0, 1, 1], [], []>} : vector<8x288xf32>, vector<288x64xf32>, vector<8x64xf32> -> vector<8x64xf32>
    %c0_23 = arith.constant 0 : index
    %c0_24 = arith.constant 0 : index
    %15 = vector.load %arg3[%c0_23, %c0_24] : memref<1x64xf32, #tpu.memory_space<vmem>>, vector<1x64xf32>
    %16 = vector.broadcast %15 : vector<1x64xf32> to vector<8x64xf32>
    %17 = arith.addf %14, %16 : vector<8x64xf32>
    %cst_25 = arith.constant 0.000000e+00 : f32
    %18 = vector.broadcast %cst_25 : f32 to vector<8x64xf32>
    %19 = arith.cmpf ogt, %17, %18 : vector<8x64xf32>
    %cst_26 = arith.constant 0.000000e+00 : f32
    %20 = vector.broadcast %cst_26 : f32 to vector<8x64xf32>
    %21 = arith.minimumf %17, %20 : vector<8x64xf32>
    %22 = math.exp %21 : vector<8x64xf32>
    %cst_27 = arith.constant 1.000000e+00 : f32
    %23 = vector.broadcast %cst_27 : f32 to vector<8x64xf32>
    %24 = arith.subf %22, %23 : vector<8x64xf32>
    %25 = arith.select %19, %17, %24 : vector<8x64xi1>, vector<8x64xf32>
    %c0_28 = arith.constant 0 : index
    %c0_29 = arith.constant 0 : index
    %c0_30 = arith.constant 0 : index
    %26 = vector.load %arg8[%c0_28, %c0_29, %c0_30] : memref<1x8x64xf32, #tpu.memory_space<vmem>>, vector<1x8x64xf32>
    %27 = vector.shape_cast %26 : vector<1x8x64xf32> to vector<8x64xf32>
    %28 = vector.shape_cast %25 : vector<8x64xf32> to vector<1x8x64xf32>
    tpu.vector_store %arg8[%c0_28, %c0_29, %c0_30], %28 {strides = array<i32>} : memref<1x8x64xf32, #tpu.memory_space<vmem>>, vector<1x8x64xf32>,
    %cst_31 = arith.constant 0.000000e+00 : f32
    %29 = vector.broadcast %cst_31 : f32 to vector<1x80xf32>
    %c0_32 = arith.constant 0 : index
    %c0_33 = arith.constant 0 : index
    %c0_34 = arith.constant 0 : index
    %30 = vector.load %arg14[%c0_32, %c0_33, %c0_34] : memref<2x5x80xf32, #tpu.memory_space<vmem>>, vector<1x1x80xf32>
    %31 = vector.shape_cast %30 : vector<1x1x80xf32> to vector<1x80xf32>
    %32 = vector.shape_cast %29 : vector<1x80xf32> to vector<1x1x80xf32>
    tpu.vector_store %arg14[%c0_32, %c0_33, %c0_34], %32 {strides = array<i32>} : memref<2x5x80xf32, #tpu.memory_space<vmem>>, vector<1x1x80xf32>,
    %cst_35 = arith.constant 0.000000e+00 : f32
    %33 = vector.broadcast %cst_35 : f32 to vector<1x80xf32>
    %c1_36 = arith.constant 1 : index
    %c4 = arith.constant 4 : index
    %c0_37 = arith.constant 0 : index
    %34 = vector.load %arg14[%c1_36, %c4, %c0_37] : memref<2x5x80xf32, #tpu.memory_space<vmem>>, vector<1x1x80xf32>
    %35 = vector.shape_cast %34 : vector<1x1x80xf32> to vector<1x80xf32>
    %36 = vector.shape_cast %33 : vector<1x80xf32> to vector<1x1x80xf32>
    tpu.vector_store %arg14[%c1_36, %c4, %c0_37], %36 {strides = array<i32>} : memref<2x5x80xf32, #tpu.memory_space<vmem>>, vector<1x1x80xf32>,
    %cst_38 = arith.constant 0.000000e+00 : f32
    %37 = vector.broadcast %cst_38 : f32 to vector<2x5x8xf32>
    %c0_39 = arith.constant 0 : index
    %c0_40 = arith.constant 0 : index
    %c0_41 = arith.constant 0 : index
    %38 = vector.load %arg14[%c0_39, %c0_40, %c0_41] : memref<2x5x80xf32, #tpu.memory_space<vmem>>, vector<2x5x8xf32>
    tpu.vector_store %arg14[%c0_39, %c0_40, %c0_41], %37 {strides = array<i32>} : memref<2x5x80xf32, #tpu.memory_space<vmem>>, vector<2x5x8xf32>,
    %cst_42 = arith.constant 0.000000e+00 : f32
    %39 = vector.broadcast %cst_42 : f32 to vector<2x5x8xf32>
    %c0_43 = arith.constant 0 : index
    %c0_44 = arith.constant 0 : index
    %c72_45 = arith.constant 72 : index
    %40 = vector.load %arg14[%c0_43, %c0_44, %c72_45] : memref<2x5x80xf32, #tpu.memory_space<vmem>>, vector<2x5x8xf32>
    tpu.vector_store %arg14[%c0_43, %c0_44, %c72_45], %39 {strides = array<i32>} : memref<2x5x80xf32, #tpu.memory_space<vmem>>, vector<2x5x8xf32>,
    %41 = vector.extract_strided_slice %25 {offsets = [1, 0], sizes = [1, 64], strides = [1, 1]} : vector<8x64xf32> to vector<1x64xf32>
    %42 = vector.extract_strided_slice %25 {offsets = [3, 0], sizes = [1, 64], strides = [1, 1]} : vector<8x64xf32> to vector<1x64xf32>
    %43 = vector.extract_strided_slice %25 {offsets = [5, 0], sizes = [1, 64], strides = [1, 1]} : vector<8x64xf32> to vector<1x64xf32>
    %44 = vector.extract_strided_slice %25 {offsets = [7, 0], sizes = [1, 64], strides = [1, 1]} : vector<8x64xf32> to vector<1x64xf32>
    %45 = tpu.concatenate %41, %42, %43, %44 in 0 : vector<1x64xf32>, vector<1x64xf32>, vector<1x64xf32>, vector<1x64xf32> -> vector<4x64xf32>
    %c0_46 = arith.constant 0 : index
    %c1_47 = arith.constant 1 : index
    %c8 = arith.constant 8 : index
    %46 = vector.load %arg14[%c0_46, %c1_47, %c8] : memref<2x5x80xf32, #tpu.memory_space<vmem>>, vector<1x4x64xf32>
    %47 = vector.shape_cast %46 : vector<1x4x64xf32> to vector<4x64xf32>
    %48 = vector.shape_cast %45 : vector<4x64xf32> to vector<1x4x64xf32>
    tpu.vector_store %arg14[%c0_46, %c1_47, %c8], %48 {strides = array<i32>} : memref<2x5x80xf32, #tpu.memory_space<vmem>>, vector<1x4x64xf32>,
    %49 = vector.extract_strided_slice %25 {offsets = [0, 0], sizes = [1, 64], strides = [1, 1]} : vector<8x64xf32> to vector<1x64xf32>
    %50 = vector.extract_strided_slice %25 {offsets = [2, 0], sizes = [1, 64], strides = [1, 1]} : vector<8x64xf32> to vector<1x64xf32>
    %51 = vector.extract_strided_slice %25 {offsets = [4, 0], sizes = [1, 64], strides = [1, 1]} : vector<8x64xf32> to vector<1x64xf32>
    %52 = vector.extract_strided_slice %25 {offsets = [6, 0], sizes = [1, 64], strides = [1, 1]} : vector<8x64xf32> to vector<1x64xf32>
    %53 = tpu.concatenate %49, %50, %51, %52 in 0 : vector<1x64xf32>, vector<1x64xf32>, vector<1x64xf32>, vector<1x64xf32> -> vector<4x64xf32>
    %c1_48 = arith.constant 1 : index
    %c0_49 = arith.constant 0 : index
    %c8_50 = arith.constant 8 : index
    %54 = vector.load %arg14[%c1_48, %c0_49, %c8_50] : memref<2x5x80xf32, #tpu.memory_space<vmem>>, vector<1x4x64xf32>
    %55 = vector.shape_cast %54 : vector<1x4x64xf32> to vector<4x64xf32>
    %56 = vector.shape_cast %53 : vector<4x64xf32> to vector<1x4x64xf32>
    tpu.vector_store %arg14[%c1_48, %c0_49, %c8_50], %56 {strides = array<i32>} : memref<2x5x80xf32, #tpu.memory_space<vmem>>, vector<1x4x64xf32>,
    %c0_51 = arith.constant 0 : index
    %c0_52 = arith.constant 0 : index
    %c0_53 = arith.constant 0 : index
    %57 = vector.load %arg14[%c0_51, %c0_52, %c0_53] : memref<2x5x80xf32, #tpu.memory_space<vmem>>, vector<1x4x80xf32>
    %58 = vector.shape_cast %57 : vector<1x4x80xf32> to vector<4x80xf32>
    %c0_54 = arith.constant 0 : index
    %c0_55 = arith.constant 0 : index
    %59 = vector.load %arg12[%c0_54, %c0_55] : memref<4x320xf32, #tpu.memory_space<vmem>>, vector<4x80xf32>
    tpu.vector_store %arg12[%c0_54, %c0_55], %58 {strides = array<i32>} : memref<4x320xf32, #tpu.memory_space<vmem>>, vector<4x80xf32>,
    %c1_56 = arith.constant 1 : index
    %c0_57 = arith.constant 0 : index
    %c0_58 = arith.constant 0 : index
    %60 = vector.load %arg14[%c1_56, %c0_57, %c0_58] : memref<2x5x80xf32, #tpu.memory_space<vmem>>, vector<1x4x80xf32>
    %61 = vector.shape_cast %60 : vector<1x4x80xf32> to vector<4x80xf32>
    %c0_59 = arith.constant 0 : index
    %c80 = arith.constant 80 : index
    %62 = vector.load %arg12[%c0_59, %c80] : memref<4x320xf32, #tpu.memory_space<vmem>>, vector<4x80xf32>
    tpu.vector_store %arg12[%c0_59, %c80], %61 {strides = array<i32>} : memref<4x320xf32, #tpu.memory_space<vmem>>, vector<4x80xf32>,
    %c0_60 = arith.constant 0 : index
    %c1_61 = arith.constant 1 : index
    %c0_62 = arith.constant 0 : index
    %63 = vector.load %arg14[%c0_60, %c1_61, %c0_62] : memref<2x5x80xf32, #tpu.memory_space<vmem>>, vector<1x4x80xf32>
    %64 = vector.shape_cast %63 : vector<1x4x80xf32> to vector<4x80xf32>
    %c0_63 = arith.constant 0 : index
    %c160 = arith.constant 160 : index
    %65 = vector.load %arg12[%c0_63, %c160] : memref<4x320xf32, #tpu.memory_space<vmem>>, vector<4x80xf32>
    tpu.vector_store %arg12[%c0_63, %c160], %64 {strides = array<i32>} : memref<4x320xf32, #tpu.memory_space<vmem>>, vector<4x80xf32>,
    %c1_64 = arith.constant 1 : index
    %c1_65 = arith.constant 1 : index
    %c0_66 = arith.constant 0 : index
    %66 = vector.load %arg14[%c1_64, %c1_65, %c0_66] : memref<2x5x80xf32, #tpu.memory_space<vmem>>, vector<1x4x80xf32>
    %67 = vector.shape_cast %66 : vector<1x4x80xf32> to vector<4x80xf32>
    %c0_67 = arith.constant 0 : index
    %c240 = arith.constant 240 : index
    %68 = vector.load %arg12[%c0_67, %c240] : memref<4x320xf32, #tpu.memory_space<vmem>>, vector<4x80xf32>
    tpu.vector_store %arg12[%c0_67, %c240], %67 {strides = array<i32>} : memref<4x320xf32, #tpu.memory_space<vmem>>, vector<4x80xf32>,
    %c0_68 = arith.constant 0 : index
    %c0_69 = arith.constant 0 : index
    %69 = vector.load %arg12[%c0_68, %c0_69] : memref<4x320xf32, #tpu.memory_space<vmem>>, vector<4x320xf32>
    %c0_70 = arith.constant 0 : index
    %c0_71 = arith.constant 0 : index
    %70 = vector.load %arg4[%c0_70, %c0_71] : memref<320x32xf32, #tpu.memory_space<vmem>>, vector<320x32xf32>
    %cst_72 = arith.constant dense<0.000000e+00> : vector<4x32xf32>
    %71 = tpu.matmul %69, %70, %cst_72 {dimension_numbers = #tpu.dot_dimension_numbers<[1], [0], [0], [1], [0, 0, 1, 1], [], []>} : vector<4x320xf32>, vector<320x32xf32>, vector<4x32xf32> -> vector<4x32xf32>
    %c0_73 = arith.constant 0 : index
    %c0_74 = arith.constant 0 : index
    %72 = vector.load %arg5[%c0_73, %c0_74] : memref<1x32xf32, #tpu.memory_space<vmem>>, vector<1x32xf32>
    %73 = vector.broadcast %72 : vector<1x32xf32> to vector<4x32xf32>
    %74 = arith.addf %71, %73 : vector<4x32xf32>
    %cst_75 = arith.constant 0.000000e+00 : f32
    %75 = vector.broadcast %cst_75 : f32 to vector<4x32xf32>
    %76 = arith.cmpf ogt, %74, %75 : vector<4x32xf32>
    %cst_76 = arith.constant 0.000000e+00 : f32
    %77 = vector.broadcast %cst_76 : f32 to vector<4x32xf32>
    %78 = arith.minimumf %74, %77 : vector<4x32xf32>
    %79 = math.exp %78 : vector<4x32xf32>
    %cst_77 = arith.constant 1.000000e+00 : f32
    %80 = vector.broadcast %cst_77 : f32 to vector<4x32xf32>
    %81 = arith.subf %79, %80 : vector<4x32xf32>
    %82 = arith.select %76, %74, %81 : vector<4x32xi1>, vector<4x32xf32>
    %c0_78 = arith.constant 0 : index
    %c0_79 = arith.constant 0 : index
    %c0_80 = arith.constant 0 : index
    %83 = vector.load %arg9[%c0_78, %c0_79, %c0_80] : memref<1x4x32xf32, #tpu.memory_space<vmem>>, vector<1x4x32xf32>
    %84 = vector.shape_cast %83 : vector<1x4x32xf32> to vector<4x32xf32>
    %85 = vector.shape_cast %82 : vector<4x32xf32> to vector<1x4x32xf32>
    tpu.vector_store %arg9[%c0_78, %c0_79, %c0_80], %85 {strides = array<i32>} : memref<1x4x32xf32, #tpu.memory_space<vmem>>, vector<1x4x32xf32>,
    %86 = vector.extract_strided_slice %82 {offsets = [0, 0], sizes = [1, 32], strides = [1, 1]} : vector<4x32xf32> to vector<1x32xf32>
    %87 = vector.extract_strided_slice %82 {offsets = [2, 0], sizes = [1, 32], strides = [1, 1]} : vector<4x32xf32> to vector<1x32xf32>
    %88 = tpu.concatenate %86, %87 in 0 : vector<1x32xf32>, vector<1x32xf32> -> vector<2x32xf32>
    %c0_81 = arith.constant 0 : index
    %c0_82 = arith.constant 0 : index
    %c0_83 = arith.constant 0 : index
    %89 = vector.load %arg15[%c0_81, %c0_82, %c0_83] : memref<2x2x32xf32, #tpu.memory_space<vmem>>, vector<1x2x32xf32>
    %90 = vector.shape_cast %89 : vector<1x2x32xf32> to vector<2x32xf32>
    %91 = vector.shape_cast %88 : vector<2x32xf32> to vector<1x2x32xf32>
    tpu.vector_store %arg15[%c0_81, %c0_82, %c0_83], %91 {strides = array<i32>} : memref<2x2x32xf32, #tpu.memory_space<vmem>>, vector<1x2x32xf32>,
    %92 = vector.extract_strided_slice %82 {offsets = [1, 0], sizes = [1, 32], strides = [1, 1]} : vector<4x32xf32> to vector<1x32xf32>
    %93 = vector.extract_strided_slice %82 {offsets = [3, 0], sizes = [1, 32], strides = [1, 1]} : vector<4x32xf32> to vector<1x32xf32>
    %94 = tpu.concatenate %92, %93 in 0 : vector<1x32xf32>, vector<1x32xf32> -> vector<2x32xf32>
    %c1_84 = arith.constant 1 : index
    %c0_85 = arith.constant 0 : index
    %c0_86 = arith.constant 0 : index
    %95 = vector.load %arg15[%c1_84, %c0_85, %c0_86] : memref<2x2x32xf32, #tpu.memory_space<vmem>>, vector<1x2x32xf32>
    %96 = vector.shape_cast %95 : vector<1x2x32xf32> to vector<2x32xf32>
    %97 = vector.shape_cast %94 : vector<2x32xf32> to vector<1x2x32xf32>
    tpu.vector_store %arg15[%c1_84, %c0_85, %c0_86], %97 {strides = array<i32>} : memref<2x2x32xf32, #tpu.memory_space<vmem>>, vector<1x2x32xf32>,
    %c0_87 = arith.constant 0 : index
    %c0_88 = arith.constant 0 : index
    %c0_89 = arith.constant 0 : index
    %98 = vector.load %arg15[%c0_87, %c0_88, %c0_89] : memref<2x2x32xf32, #tpu.memory_space<vmem>>, vector<1x1x32xf32>
    %99 = vector.shape_cast %98 : vector<1x1x32xf32> to vector<1x32xf32>
    %c0_90 = arith.constant 0 : index
    %c0_91 = arith.constant 0 : index
    %100 = vector.load %arg13[%c0_90, %c0_91] : memref<1x128xf32, #tpu.memory_space<vmem>>, vector<1x32xf32>
    tpu.vector_store %arg13[%c0_90, %c0_91], %99 {strides = array<i32>} : memref<1x128xf32, #tpu.memory_space<vmem>>, vector<1x32xf32>,
    %c1_92 = arith.constant 1 : index
    %c0_93 = arith.constant 0 : index
    %c0_94 = arith.constant 0 : index
    %101 = vector.load %arg15[%c1_92, %c0_93, %c0_94] : memref<2x2x32xf32, #tpu.memory_space<vmem>>, vector<1x1x32xf32>
    %102 = vector.shape_cast %101 : vector<1x1x32xf32> to vector<1x32xf32>
    %c0_95 = arith.constant 0 : index
    %c32 = arith.constant 32 : index
    %103 = vector.load %arg13[%c0_95, %c32] : memref<1x128xf32, #tpu.memory_space<vmem>>, vector<1x32xf32>
    tpu.vector_store %arg13[%c0_95, %c32], %102 {strides = array<i32>} : memref<1x128xf32, #tpu.memory_space<vmem>>, vector<1x32xf32>,
    %c0_96 = arith.constant 0 : index
    %c1_97 = arith.constant 1 : index
    %c0_98 = arith.constant 0 : index
    %104 = vector.load %arg15[%c0_96, %c1_97, %c0_98] : memref<2x2x32xf32, #tpu.memory_space<vmem>>, vector<1x1x32xf32>
    %105 = vector.shape_cast %104 : vector<1x1x32xf32> to vector<1x32xf32>
    %c0_99 = arith.constant 0 : index
    %c64 = arith.constant 64 : index
    %106 = vector.load %arg13[%c0_99, %c64] : memref<1x128xf32, #tpu.memory_space<vmem>>, vector<1x32xf32>
    tpu.vector_store %arg13[%c0_99, %c64], %105 {strides = array<i32>} : memref<1x128xf32, #tpu.memory_space<vmem>>, vector<1x32xf32>,
    %c1_100 = arith.constant 1 : index
    %c1_101 = arith.constant 1 : index
    %c0_102 = arith.constant 0 : index
    %107 = vector.load %arg15[%c1_100, %c1_101, %c0_102] : memref<2x2x32xf32, #tpu.memory_space<vmem>>, vector<1x1x32xf32>
    %108 = vector.shape_cast %107 : vector<1x1x32xf32> to vector<1x32xf32>
    %c0_103 = arith.constant 0 : index
    %c96 = arith.constant 96 : index
    %109 = vector.load %arg13[%c0_103, %c96] : memref<1x128xf32, #tpu.memory_space<vmem>>, vector<1x32xf32>
    tpu.vector_store %arg13[%c0_103, %c96], %108 {strides = array<i32>} : memref<1x128xf32, #tpu.memory_space<vmem>>, vector<1x32xf32>,
    %c0_104 = arith.constant 0 : index
    %c0_105 = arith.constant 0 : index
    %110 = vector.load %arg13[%c0_104, %c0_105] : memref<1x128xf32, #tpu.memory_space<vmem>>, vector<1x128xf32>
    %c0_106 = arith.constant 0 : index
    %c0_107 = arith.constant 0 : index
    %111 = vector.load %arg6[%c0_106, %c0_107] : memref<128x16xf32, #tpu.memory_space<vmem>>, vector<128x16xf32>
    %cst_108 = arith.constant dense<0.000000e+00> : vector<1x16xf32>
    %112 = tpu.matmul %110, %111, %cst_108 {dimension_numbers = #tpu.dot_dimension_numbers<[1], [0], [0], [1], [0, 0, 1, 1], [], []>} : vector<1x128xf32>, vector<128x16xf32>, vector<1x16xf32> -> vector<1x16xf32>
    %c0_109 = arith.constant 0 : index
    %c0_110 = arith.constant 0 : index
    %113 = vector.load %arg7[%c0_109, %c0_110] : memref<1x16xf32, #tpu.memory_space<vmem>>, vector<1x16xf32>
    %114 = arith.addf %112, %113 : vector<1x16xf32>
    %cst_111 = arith.constant 0.000000e+00 : f32
    %115 = vector.broadcast %cst_111 : f32 to vector<1x16xf32>
    %116 = arith.cmpf ogt, %114, %115 : vector<1x16xf32>
    %cst_112 = arith.constant 0.000000e+00 : f32
    %117 = vector.broadcast %cst_112 : f32 to vector<1x16xf32>
    %118 = arith.minimumf %114, %117 : vector<1x16xf32>
    %119 = math.exp %118 : vector<1x16xf32>
    %cst_113 = arith.constant 1.000000e+00 : f32
    %120 = vector.broadcast %cst_113 : f32 to vector<1x16xf32>
    %121 = arith.subf %119, %120 : vector<1x16xf32>
    %122 = arith.select %116, %114, %121 : vector<1x16xi1>, vector<1x16xf32>
    %c0_114 = arith.constant 0 : index
    %c0_115 = arith.constant 0 : index
    %c0_116 = arith.constant 0 : index
    %123 = vector.load %arg10[%c0_114, %c0_115, %c0_116] : memref<1x1x16xf32, #tpu.memory_space<vmem>>, vector<1x1x16xf32>
    %124 = vector.shape_cast %123 : vector<1x1x16xf32> to vector<1x16xf32>
    %125 = vector.shape_cast %122 : vector<1x16xf32> to vector<1x1x16xf32>
    tpu.vector_store %arg10[%c0_114, %c0_115, %c0_116], %125 {strides = array<i32>} : memref<1x1x16xf32, #tpu.memory_space<vmem>>, vector<1x1x16xf32>,
    return
  }
  func.func @transform_0(%arg0: i32) -> (i32, i32, i32, i32) {
    %c0_i32 = arith.constant 0 : i32
    %c0_i32_0 = arith.constant 0 : i32
    %c0_i32_1 = arith.constant 0 : i32
    %c0_i32_2 = arith.constant 0 : i32
    return %c0_i32, %arg0, %c0_i32_0, %c0_i32_1 : i32, i32, i32, i32
  }
  func.func @transform_1(%arg0: i32) -> (i32, i32) {
    %c0_i32 = arith.constant 0 : i32
    %c0_i32_0 = arith.constant 0 : i32
    %c0_i32_1 = arith.constant 0 : i32
    return %c0_i32, %c0_i32_0 : i32, i32
  }
  func.func @transform_2(%arg0: i32) -> (i32, i32) {
    %c0_i32 = arith.constant 0 : i32
    %c0_i32_0 = arith.constant 0 : i32
    %c0_i32_1 = arith.constant 0 : i32
    return %c0_i32, %c0_i32_0 : i32, i32
  }
  func.func @transform_3(%arg0: i32) -> (i32, i32) {
    %c0_i32 = arith.constant 0 : i32
    %c0_i32_0 = arith.constant 0 : i32
    %c0_i32_1 = arith.constant 0 : i32
    return %c0_i32, %c0_i32_0 : i32, i32
  }
  func.func @transform_4(%arg0: i32) -> (i32, i32) {
    %c0_i32 = arith.constant 0 : i32
    %c0_i32_0 = arith.constant 0 : i32
    %c0_i32_1 = arith.constant 0 : i32
    return %c0_i32, %c0_i32_0 : i32, i32
  }
  func.func @transform_5(%arg0: i32) -> (i32, i32) {
    %c0_i32 = arith.constant 0 : i32
    %c0_i32_0 = arith.constant 0 : i32
    %c0_i32_1 = arith.constant 0 : i32
    return %c0_i32, %c0_i32_0 : i32, i32
  }
  func.func @transform_6(%arg0: i32) -> (i32, i32) {
    %c0_i32 = arith.constant 0 : i32
    %c0_i32_0 = arith.constant 0 : i32
    %c0_i32_1 = arith.constant 0 : i32
    return %c0_i32, %c0_i32_0 : i32, i32
  }
  func.func @transform_7(%arg0: i32) -> (i32, i32, i32) {
    %c0_i32 = arith.constant 0 : i32
    %c0_i32_0 = arith.constant 0 : i32
    %c0_i32_1 = arith.constant 0 : i32
    return %arg0, %c0_i32, %c0_i32_0 : i32, i32, i32
  }
  func.func @transform_8(%arg0: i32) -> (i32, i32, i32) {
    %c0_i32 = arith.constant 0 : i32
    %c0_i32_0 = arith.constant 0 : i32
    %c0_i32_1 = arith.constant 0 : i32
    return %arg0, %c0_i32, %c0_i32_0 : i32, i32, i32
  }
  func.func @transform_9(%arg0: i32) -> (i32, i32, i32) {
    %c0_i32 = arith.constant 0 : i32
    %c0_i32_0 = arith.constant 0 : i32
    %c0_i32_1 = arith.constant 0 : i32
    return %arg0, %c0_i32, %c0_i32_0 : i32, i32, i32
  }
}

</mosaic_0001>

<bundles_post_ra>
// kernel: tile.14
= control target key start
LH: loop header
LB: loop body
LE: loop exit
PB: predicated region body
PF: predicated region fallthrough
CT: control target
= control target key end

     0   :  { %s22_s0 = inlined_call_operand.vmem [shape: f32[8], index: 0, kind: input, shape index: {}]   ;;  %s23_s1 = inlined_call_operand.vmem [shape: f32[8,8], index: 1, kind: output, shape index: {}]  }
   0x1   :  { %v4_v0 = vld [vmem:[%s22_s0] ss:$0 sm:$0xff] }
   0x2   :  { %5 = vst [vmem:[%s23_s1] sm:$0xff] %v4_v0 }

// kernel: tile.15
= control target key start
LH: loop header
LB: loop body
LE: loop exit
PB: predicated region body
PF: predicated region fallthrough
CT: control target
= control target key end

     0   :  { %s67_s10 = smov 56   ;;  %s68_s11 = smov 40   ;;  %vm3_vm0 = vcmask 64512   ;;  %vm9_vm1 = vcmask 523712   ;;  %vm15_vm2 = vcmask 458112   ;;  %vm21_vm3 = vcmask 392512   ;;  %s111_s0 = inlined_call_operand.vmem [shape: f32[8,8], index: 0, kind: input, shape index: {}]   ;;  %s112_s1 = inlined_call_operand.vmem [shape: f32[1,64], index: 1, kind: output, shape index: {}]  }
   0x1   :  { %v53_v0 = vld [vmem:[%s111_s0 + $0x7] sm:$0x1]   ;;  %v55_v1 = vld [vmem:[%s111_s0 + $0x5] sm:$0x1]   ;;  %v54_v2 = vld [vmem:[%s111_s0 + $0x6] sm:$0x1]  }
   0x2   :  { %7 = vrot.lane.b32.xlu0 %v53_v0, %s67_s10  ;;  %19 = vrot.lane.b32.xlu1 %v55_v1, %s68_s11  ;;  %v56_v3 = vld [vmem:[%s111_s0 + $0x4] sm:$0x1]   ;;  %v2_v4 = vld [vmem:[%s111_s0] sm:$0x1]   ;;  %s69_s18 = smov 48   ;;  %s70_s19 = smov 32  }
   0x3   :  { %4 = vst.msk [vmem:[#allocation0] sm:$0x1] %vm3_vm0, %v2_v4   ;;  %v57_v5 = vld [vmem:[%s111_s0 + $0x3] sm:$0x1]   ;;  %v58_v6 = vld [vmem:[%s111_s0 + $0x2] sm:$0x1]  }
   0x4   :  { %s71_s24 = smov 24   ;;  %s72_s25 = smov 16   ;;  %v59_v7 = vld [vmem:[%s111_s0 + $0x1] sm:$0x1]   ;;  %vm27_vm4 = vcmask 326912   ;;  %vm33_vm5 = vcmask 261312  }
   0x5   :  { %s73_s0 = smov 8   ;;  %vm39_vm6 = vcmask 195712   ;;  %vm45_vm7 = vcmask 130112  }
   0x6   :  { %13 = vrot.lane.b32.xlu0 %v54_v2, %s69_s18  ;;  %25 = vrot.lane.b32.xlu1 %v56_v3, %s70_s19 }
   0xa   :  { %31 = vrot.lane.b32.xlu0 %v57_v5, %s71_s24  ;;  %37 = vrot.lane.b32.xlu1 %v58_v6, %s72_s25 }
   0xe   :  { %43 = vrot.lane.b32.xlu0 %v59_v7, %s73_s0 }
  0x74   :  { %v8_v8 = vpop.permute.xlu0 %7   ;;  %v20_v9 = vpop.permute.xlu1 %19  }
  0x75   :  { %10 = vst.msk [vmem:[#allocation0] sm:$0x1] %vm9_vm1, %v8_v8  }
  0x78   :  { %v14_v10 = vpop.permute.xlu0 %13   ;;  %v26_v11 = vpop.permute.xlu1 %25  }
  0x79   :  { %16 = vst.msk [vmem:[#allocation0] sm:$0x1] %vm15_vm2, %v14_v10  }
  0x7a   :  { %22 = vst.msk [vmem:[#allocation0] sm:$0x1] %vm21_vm3, %v20_v9  }
  0x7b   :  { %28 = vst.msk [vmem:[#allocation0] sm:$0x1] %vm27_vm4, %v26_v11  }
  0x7c   :  { %v32_v12 = vpop.permute.xlu0 %31   ;;  %v38_v13 = vpop.permute.xlu1 %37  }
  0x7d   :  { %34 = vst.msk [vmem:[#allocation0] sm:$0x1] %vm33_vm5, %v32_v12  }
  0x7e   :  { %40 = vst.msk [vmem:[#allocation0] sm:$0x1] %vm39_vm6, %v38_v13  }
  0x80   :  { %v44_v14 = vpop.permute.xlu0 %43  }
  0x81   :  { %46 = vst.msk [vmem:[#allocation0] sm:$0x1] %vm45_vm7, %v44_v14  }
  0x88   :  { %v50_v15 = vld [vmem:[#allocation0] sm:$0x1] }
  0x89   :  { %52 = vst [vmem:[%s112_s1] sm:$0x1] %v50_v15 }

// kernel: tile.19
= control target key start
LH: loop header
LB: loop body
LE: loop exit
PB: predicated region body
PF: predicated region fallthrough
CT: control target
= control target key end

     0   :  { %s22_s0 = inlined_call_operand.vmem [shape: f32[8], index: 0, kind: input, shape index: {}]   ;;  %s23_s1 = inlined_call_operand.vmem [shape: f32[4,8], index: 1, kind: output, shape index: {}]  }
   0x1   :  { %v4_v0 = vld [vmem:[%s22_s0] ss:$0 sm:$0xff] }
   0x2   :  { %5 = vst [vmem:[%s23_s1] sm:$0xf] %v4_v0 }

// kernel: tile.20
= control target key start
LH: loop header
LB: loop body
LE: loop exit
PB: predicated region body
PF: predicated region fallthrough
CT: control target
= control target key end

     0   :  { %vm7_vm0 = vcmask 64512   ;;  %s37_s8 = smov 8   ;;  %s38_s9 = smov 16   ;;  %vm13_vm1 = vcmask 261312   ;;  %vm19_vm2 = vcmask 195712   ;;  %vm25_vm3 = vcmask 130112   ;;  %s55_s0 = inlined_call_operand.vmem [shape: f32[4,8], index: 0, kind: input, shape index: {}]   ;;  %s56_s1 = inlined_call_operand.vmem [shape: f32[1,32], index: 1, kind: output, shape index: {}]  }
   0x1   :  { %v4_v0 = vld [vmem:[%s55_s0] sm:$0xf]  ;;  %s36_s0 = smov 24  }
   0x2   :  { %5 = vst [vmem:[#allocation1] sm:$0xf] %v4_v0 }
   0x9   :  { %v10_v1 = vld [vmem:[#allocation1 + $0x3] sm:$0x1]   ;;  %v22_v2 = vld [vmem:[#allocation1 + $0x1] sm:$0x1]   ;;  %v6_v3 = vld [vmem:[#allocation1] sm:$0x1]  }
   0xa   :  { %11 = vrot.lane.b32.xlu0 %v10_v1, %s36_s0  ;;  %23 = vrot.lane.b32.xlu1 %v22_v2, %s37_s8  ;;  %v16_v4 = vld [vmem:[#allocation1 + $0x2] sm:$0x1]   ;;  %8 = vst.msk [vmem:[#allocation0] sm:$0x1] %vm7_vm0, %v6_v3  }
   0xe   :  { %17 = vrot.lane.b32.xlu0 %v16_v4, %s38_s9 }
  0x7c   :  { %v12_v5 = vpop.permute.xlu0 %11   ;;  %v24_v6 = vpop.permute.xlu1 %23  }
  0x7d   :  { %14 = vst.msk [vmem:[#allocation0] sm:$0x1] %vm13_vm1, %v12_v5  }
  0x80   :  { %v18_v7 = vpop.permute.xlu0 %17  }
  0x81   :  { %20 = vst.msk [vmem:[#allocation0] sm:$0x1] %vm19_vm2, %v18_v7  }
  0x82   :  { %26 = vst.msk [vmem:[#allocation0] sm:$0x1] %vm25_vm3, %v24_v6  }
  0x89   :  { %v30_v8 = vld [vmem:[#allocation0] sm:$0x1] }
  0x8a   :  { %32 = vst [vmem:[%s56_s1] sm:$0x1] %v30_v8 }

// kernel: conv_encoder_forward.1
= control target key start
LH: loop header
LB: loop body
LE: loop exit
PB: predicated region body
PF: predicated region fallthrough
CT: control target
= control target key end

     0   :  { %s2090_s0 = inlined_call_operand.vmem [shape: f32[2,2,9,72], index: 0, kind: input, shape index: {}]   ;;  %s2091_s1 = inlined_call_operand.vmem [shape: f32[288,64], index: 1, kind: input, shape index: {}]   ;;  %s2092_s2 = inlined_call_operand.vmem [shape: f32[1,64], index: 2, kind: input, shape index: {}]   ;;  %s2093_s3 = inlined_call_operand.vmem [shape: f32[320,32], index: 3, kind: input, shape index: {}]   ;;  %s2094_s4 = inlined_call_operand.vmem [shape: f32[1,32], index: 4, kind: input, shape index: {}]   ;;  %s2095_s5 = inlined_call_operand.vmem [shape: f32[128,16], index: 5, kind: input, shape index: {}]   ;;  %s2096_s6 = inlined_call_operand.vmem [shape: f32[1,16], index: 6, kind: input, shape index: {}]   ;;  %s2097_s7 = inlined_call_operand.vmem [shape: f32[2,8,64], index: 7, kind: output, shape index: {0}]   ;;  %s2098_s8 = inlined_call_operand.vmem [shape: f32[2,4,32], index: 8, kind: output, shape index: {1}]   ;;  %s2099_s9 = inlined_call_operand.hbm [shape: f32[2,1,16], index: 9, kind: output, shape index: {2}]  }
   0x1   :  { %2100 = sst [smem:[#allocation11_spill]] %s2090_s0 }
   0x2   :  { %2101 = sst [smem:[#allocation12_spill]] %s2091_s1 }
   0x3   :  { %15 = vsyncpa [#allocation9], 0 }
   0x4   :  { %17 = vsyncpa [#allocation9 + $0x1], 0  ;;  %s1647_s30 = smov 0   ;;  %s1649_s10 = smov 0  }
   0x5   :  { %s1651_s11 = smov 0   ;;  %s1653_s12 = smov 0  }
   0x6 LB: > { %s1668_s13 = sadd.s32 4294967295, %s1582_s12   ;;  %s1167_s14 = sadd.s32 4294967294, %s1582_s12   ;;  %s1582_s12 = sphi %s1653_s12, %s2109_s12   ;;  %s1578_s11 = sphi %s1651_s11, %s2108_s11   ;;  %s1574_s10 = sphi %s1649_s10, %s2107_s10   ;;  %s1570_s30 = sphi %s1647_s30, %s2106_s30  }
   0x7   : > { %s1672_s15 = sadd.s32 1, %s1582_s12   ;;  %s30_s16 = sadd.s32 1, %s1578_s11 }
   0x8   : > { %s27_s17 = ssub.s32 %s1582_s12, %s1672_s15  ;;  %p37_p0 = scmp.ne.s32.totalorder %s1578_s11, %s1574_s10 }
   0x9   : > { %p28_p1 = scmp.eq.s32.totalorder %s27_s17, 0  ;;  %p38_p2 = scmp.eq.s32.totalorder %s1582_s12, 0 }
   0xa   : > { %p245_p3 = scmp.eq.s32.totalorder %s1668_s13, 1  ;;  %p250_p4 = scmp.ne.s32.totalorder %s1574_s10, %s1570_s30 }
   0xb   : > { %s1684_s18 = scalar_select %p28_p1, %s1578_s11, %s30_s16  }
   0xc   : > { %p39_p5 = por %p38_p2, %p37_p0  ;;  %p1686_p6 = por %p245_p3, %p37_p0 }
   0xd   : > { %p251_p7 = scmp.eq.s32.totalorder %s1167_s14, 1  ;;  %p1169_p9 = scmp.ge.s32.totalorder %s1582_s12, 2 }
   0xf   : > { %p1690_p8 = por %p251_p7, %p250_p4  ;;  %285 = sbr.rel (%p1169_p9) target bundleno = 34 (0x22), region = 40 }
  0x16   : > { %288 = sbr.rel (!%p39_p5) target bundleno = 34 (0x22), region = 44  ;;  %s290_s21 = sand.u32 (%p39_p5), 1, %s1578_s11  }
  0x17   : > { %s1189_s22 = sshll.u32 (%p39_p5), %s1582_s12, 4  ;;  %s1170_s23 = sshll.u32 (%p39_p5), %s290_s21, 5 }
  0x18   : > { %s2104_s0 = sld [smem:[#allocation11_spill]] (%p39_p5)  ;;  %s292_s27 = scalar_lea.vmem (%p39_p5), [#allocation7], %s1170_s23 }
  0x1e   : > { %s295_s26 = scalar_lea.vmem %s2104_s0, %s1189_s22 }
  0x1f   : > { %v329_v0 = vld [vmem:[%s295_s26] sm:$0xff]  ;;  %v331_v1 = vld [vmem:[%s295_s26 + $0x8] sm:$0xff] }
  0x20   : > { %v333_v2 = vld [vmem:[%s295_s26 + $0x20] sm:$0xff]  ;;  %330 = vst [vmem:[%s292_s27] sm:$0xff] %v329_v0  ;;  %332 = vst [vmem:[%s292_s27 + $0x8] sm:$0xff] %v331_v1  ;;  %v335_v3 = vld [vmem:[%s295_s26 + $0x28] sm:$0xff] }
  0x21   : > { %334 = vst [vmem:[%s292_s27 + $0x10] sm:$0xff] %v333_v2  ;;  %336 = vst [vmem:[%s292_s27 + $0x18] sm:$0xff] %v335_v3 }
  0x22 PF: > { %p1173_p10 = scmp.ge.s32.totalorder %s1582_s12, 1  ;;  %p341_p11 = scmp.lt.s32.totalorder %s1582_s12, 3 }
  0x24   : > { %p342_p12 = pnand %p1173_p10, %p341_p11 }
  0x25   : > { %s1705_s28 = sand.u32 (!%p342_p12), 1, %s1574_s10   ;;  %s2105_s1 = sld [smem:[#allocation12_spill]] (!%p342_p12)  ;;  %vm399_vm0 = vcmask (!%p342_p12), 588800   ;;  %v1587_v56 = vmov (!%p342_p12), 0.0|0.0   ;;  %vm407_vm1 = vcmask (!%p342_p12), 1048128   ;;  %vm409_vm2 = vcmask (!%p342_p12), 130048  }
  0x26   : > { %345 = sbr.rel (%p342_p12) target bundleno = 1290 (0x50a), region = 82  ;;  %s1174_s23 = sshll.u32 (!%p342_p12), %s1705_s28, 5  ;;  %vm425_vm3 = vcmask (!%p342_p12), 261120   ;;  %vm416_vm4 = vcmask (!%p342_p12), 720000   ;;  %vm423_vm5 = vcmask (!%p342_p12), 1048256   ;;  %vm1588_vm6 = vmmov (!%p342_p12), 0  }
  0x27   : > { %s350_s24 = scalar_lea.vmem (!%p342_p12), [#allocation7], %s1174_s23  ;;  %s1584_s27 = smov (!%p342_p12), 72   ;;  %vm624_vm7 = vcmask (!%p342_p12), 647168   ;;  %vm628_vm8 = vcmask (!%p342_p12), 61440   ;;  %vm631_vm9 = vcmask (!%p342_p12), 651840   ;;  %vm622_vm10 = vcmask (!%p342_p12), 523264  }
  0x28   : > { %v1177_v15 = vld [vmem:[%s350_s24 + $0x10] sm:$0xff] (!%p342_p12)  ;;  %s1585_s29 = smov (!%p342_p12), 88   ;;  %v411_v19 = vld [vmem:[%s350_s24 + $0x1] sm:$0xff] (!%p342_p12)  ;;  %p390_p13 = scmp.lt.s32.totalorder (!%p342_p12), %s1668_s13, 1  ;;  %vm643_vm12 = vcmask (!%p342_p12), 1040384   ;;  %vm645_vm13 = vcmask (!%p342_p12), 1041408  }
  0x29   : > { %v1178_v16 = vld [vmem:[%s350_s24 + $0x11] sm:$0xff] (!%p342_p12)  ;;  %404 = vrot.lane.b32.xlu0 (!%p342_p12), %v1177_v15, %s1584_s27  ;;  %s1586_s27 = smov (!%p342_p12), 16   ;;  %v398_v26 = vld [vmem:[%s350_s24] sm:$0xff] (!%p342_p12)  ;;  %vm647_vm14 = vcmask (!%p342_p12), 1042432   ;;  %s1590_s0 = smov (!%p342_p12), 8   ;;  %vm653_vm15 = vcmask (!%p342_p12), 584768  }
  0x2a   : > { %420 = vrot.lane.b32.xlu1 (!%p342_p12), %v1178_v16, %s1585_s29  ;;  %400 = vst.msk [vmem:[#allocation2] sm:$0xff] (!%p342_p12), %vm399_vm0, %v398_v26  ;;  %vm664_vm0 = vcmask (!%p342_p12), 650240   ;;  %s1592_s16 = smov (!%p342_p12), 112   ;;  %s1593_s17 = smov (!%p342_p12), 32  }
  0x2b   : > { %v446_v4 = vld [vmem:[%s2105_s1 + $0x80] sm:$0xff] (!%p342_p12)  ;;  %v447_v5 = vld [vmem:[%s2105_s1 + $0x88] sm:$0xff] (!%p342_p12)  ;;  %v448_v9 = vld [vmem:[%s2105_s1 + $0x90] sm:$0xff] (!%p342_p12)  ;;  %s1594_s24 = smov (!%p342_p12), 64   ;;  %s1186_s29 = sshll.u32 (!%p342_p12), %s1668_s13, 4 }
  0x2c   : > { %v430_v6 = vld [vmem:[%s2105_s1] sm:$0xff] (!%p342_p12)  ;;  %v1356_v7 = vpack.c.bf16 (!%p342_p12), %v447_v5, %v446_v4  ;;  %v431_v8 = vld [vmem:[%s2105_s1 + $0x8] sm:$0xff] (!%p342_p12)  ;;  %v449_v10 = vld [vmem:[%s2105_s1 + $0x98] sm:$0xff] (!%p342_p12)  ;;  %v1589_v4 = vmov (!%p342_p12), 0.0   ;;  %s1596_s22 = smov (!%p342_p12), [#allocation8]  }
  0x2d   : > { %v1358_v11 = vpack.c.bf16 %v431_v8, %v430_v6  ;;  %v1360_v12 = vpack.c.bf16 %v449_v10, %v448_v9  ;;  %v432_v13 = vld [vmem:[%s2105_s1 + $0x10] sm:$0xff]  ;;  %v433_v14 = vld [vmem:[%s2105_s1 + $0x18] sm:$0xff]  ;;  %v450_v17 = vld [vmem:[%s2105_s1 + $0xa0] sm:$0xff]  ;;  %413 = vrot.lane.b32.xlu0 %v411_v19, %s1586_s27  ;;  %627 = vst.msk [vmem:[#allocation5 + $0xc] sm:$0x1] %vm624_vm7, %v1589_v4  ;;  %s1836_s26 = scalar_select %p390_p13, %s1668_s13, 1 }
  0x2e   : > { %1357 = vmatprep.subr.bf16.mxu0 %v1356_v7  ;;  %v451_v18 = vld [vmem:[%s2105_s1 + $0xa8] sm:$0xff]  ;;  %v1362_v20 = vpack.c.bf16 %v433_v14, %v432_v13  ;;  %v434_v22 = vld [vmem:[%s2105_s1 + $0x20] sm:$0xff]  ;;  %v452_v24 = vld [vmem:[%s2105_s1 + $0xb0] sm:$0xff]  ;;  %625 = vst.msk [vmem:[#allocation5] sm:$0x1] %vm624_vm7, %v1589_v4 }
  0x2f   : > { %1359 = vmatpush3.bf16.msra.mxu0 %v1358_v11  ;;  %v1364_v21 = vpack.c.bf16 %v451_v18, %v450_v17  ;;  %v435_v23 = vld [vmem:[%s2105_s1 + $0x28] sm:$0xff]  ;;  %v453_v25 = vld [vmem:[%s2105_s1 + $0xb8] sm:$0xff]  ;;  %v436_v29 = vld [vmem:[%s2105_s1 + $0x30] sm:$0xff]  ;;  %630 = vst.msk [vmem:[#allocation5 + $0x8] sm:$0x1f] %vm628_vm8, %v1589_v4  ;;  %s1175_s27 = sshll.u32 %s1836_s26, 3 }
  0x30   : > { %1361 = vmatprep.subr.bf16.mxu0 %v1360_v12  ;;  %v1366_v27 = vpack.c.bf16 %v435_v23, %v434_v22  ;;  %v1368_v28 = vpack.c.bf16 %v453_v25, %v452_v24  ;;  %v437_v30 = vld [vmem:[%s2105_s1 + $0x38] sm:$0xff]  ;;  %v454_v31 = vld [vmem:[%s2105_s1 + $0xc0] sm:$0xff]  ;;  %v455_v32 = vld [vmem:[%s2105_s1 + $0xc8] sm:$0xff]  ;;  %629 = vst.msk [vmem:[#allocation5] sm:$0x1f] %vm628_vm8, %v1589_v4  ;;  %s393_s23 = scalar_lea.vmem %s2097_s7, %s1175_s27  ;;  %vm690_vm8 = vcmask 916480  }
  0x31   : > { %v1370_v33 = vpack.c.bf16 %v437_v30, %v436_v29  ;;  %v1372_v34 = vpack.c.bf16 %v455_v32, %v454_v31  ;;  %v438_v35 = vld [vmem:[%s2105_s1 + $0x40] sm:$0xff]  ;;  %v439_v36 = vld [vmem:[%s2105_s1 + $0x48] sm:$0xff]  ;;  %v456_v37 = vld [vmem:[%s2105_s1 + $0xd0] sm:$0xff]  ;;  %633 = vst.msk [vmem:[#allocation5 + $0x8] sm:$0x1f] %vm631_vm9, %v1589_v4  ;;  %s1176_s21 = sshll.u32 %s1836_s26, 2 }
  0x32   : > { %v457_v38 = vld [vmem:[%s2105_s1 + $0xd8] sm:$0xff]  ;;  %v1374_v39 = vpack.c.bf16 %v439_v36, %v438_v35  ;;  %v440_v41 = vld [vmem:[%s2105_s1 + $0x50] sm:$0xff]  ;;  %v458_v43 = vld [vmem:[%s2105_s1 + $0xe0] sm:$0xff]  ;;  %632 = vst.msk [vmem:[#allocation5] sm:$0x1f] %vm631_vm9, %v1589_v4  ;;  %vm683_vm9 = vcmask 912640   ;;  %s397_s25 = scalar_lea.vmem %s2098_s8, %s1176_s21  ;;  %s2046_s21 = scalar_lea.hbm %s2099_s9, %s1186_s29 }
  0x33   : > { %1363 = vmatpush3.bf16.msra.mxu0 %v1362_v20  ;;  %v1376_v40 = vpack.c.bf16 %v457_v38, %v456_v37  ;;  %v441_v42 = vld [vmem:[%s2105_s1 + $0x58] sm:$0xff]  ;;  %v459_v44 = vld [vmem:[%s2105_s1 + $0xe8] sm:$0xff]  ;;  %v442_v47 = vld [vmem:[%s2105_s1 + $0x60] sm:$0xff]  ;;  %s389_s26 = scalar_lea.vmem [#allocation8], %s1705_s28 }
  0x34   : > { %1365 = vmatprep.subr.bf16.mxu0 %v1364_v21  ;;  %v1378_v45 = vpack.c.bf16 %v441_v42, %v440_v41  ;;  %v1380_v46 = vpack.c.bf16 %v459_v44, %v458_v43  ;;  %v443_v48 = vld [vmem:[%s2105_s1 + $0x68] sm:$0xff]  ;;  %v460_v49 = vld [vmem:[%s2105_s1 + $0xf0] sm:$0xff]  ;;  %v461_v50 = vld [vmem:[%s2105_s1 + $0xf8] sm:$0xff]  ;;  %s1058_s14 = sshll.u32 %s389_s26, 4  ;;  %s2048_s14 = int_to_ptr.vmem [resolvable:$true] %s1058_s14 }
  0x35   : > { %v1382_v51 = vpack.c.bf16 %v443_v48, %v442_v47  ;;  %v1384_v52 = vpack.c.bf16 %v461_v50, %v460_v49  ;;  %v444_v53 = vld [vmem:[%s2105_s1 + $0x70] sm:$0xff]  ;;  %v445_v54 = vld [vmem:[%s2105_s1 + $0x78] sm:$0xff]  ;;  %v462_v60 = vld [vmem:[%s2105_s1 + $0x100] sm:$0xff]  ;;  %s1520_s13 = scalar_lea.vmem %s2048_s14, 16 }
  0x36   : > { %v1386_v55 = vpack.c.bf16 %v445_v54, %v444_v53  ;;  %v463_v61 = vld [vmem:[%s2105_s1 + $0x108] sm:$0xff]  ;;  %v464_v0 = vld [vmem:[%s2105_s1 + $0x110] sm:$0xff]  ;;  %v465_v1 = vld [vmem:[%s2105_s1 + $0x118] sm:$0xff]  ;;  %s1040_s1 = scalar_lea.sflag [#allocation9], %s1705_s28  ;;  %p1521_p0 = scmp.ne.s32.totalorder %s2048_s14, %s1520_s13 }
  0x37   : > { %1367 = vmatpush3.bf16.msra.mxu0 %v1366_v27  ;;  %v1389_v62 = vpack.c.bf16 %v463_v61, %v462_v60  ;;  %v1392_v3 = vpack.c.bf16 %v465_v1, %v464_v0  ;;  %v1179_v9 = vld [vmem:[%s2092_s2] ss:$0 sm:$0xff]  ;;  %v716_v30 = vld [vmem:[%s2093_s3 + $0x88] sm:$0xff]  ;;  %v718_v36 = vld [vmem:[%s2093_s3 + $0x98] sm:$0xff] }
  0x38   : > { %1369 = vmatprep.subr.bf16.mxu0 %v1368_v28  ;;  %v715_v29 = vld [vmem:[%s2093_s3 + $0x80] sm:$0xff]  ;;  %v701_v37 = vld [vmem:[%s2093_s3 + $0x10] sm:$0xff]  ;;  %v702_v38 = vld [vmem:[%s2093_s3 + $0x18] sm:$0xff]  ;;  %p1522_p1 = pnand %p1521_p0, %p1686_p6 }
  0x39   : > { %v699_v31 = vld [vmem:[%s2093_s3] sm:$0xff]  ;;  %v1394_v32 = vpack.c.bf16 %v716_v30, %v715_v29  ;;  %v720_v41 = vld [vmem:[%s2093_s3 + $0xa8] sm:$0xff]  ;;  %v1400_v42 = vpack.c.bf16 %v702_v38, %v701_v37  ;;  %v721_v47 = vld [vmem:[%s2093_s3 + $0xb0] sm:$0xff] }
  0x3a   : > { %v703_v44 = vld [vmem:[%s2093_s3 + $0x20] sm:$0xff]  ;;  %v722_v48 = vld [vmem:[%s2093_s3 + $0xb8] sm:$0xff]  ;;  %v732_v49 = vld [vmem:[%s2093_s3 + $0x108] sm:$0xff]  ;;  %p1523_p2 = pneg %p1522_p1 }
  0x3b   : > { %1371 = vmatpush3.bf16.msra.mxu0 %v1370_v33  ;;  %v700_v33 = vld [vmem:[%s2093_s3 + $0x8] sm:$0xff]  ;;  %1395 = vmatprep.subr.bf16.mxu1 %v1394_v32  ;;  %v705_v53 = vld [vmem:[%s2093_s3 + $0x30] sm:$0xff]  ;;  %v706_v54 = vld [vmem:[%s2093_s3 + $0x38] sm:$0xff] }
  0x3c   : > { %1373 = vmatprep.subr.bf16.mxu0 %v1372_v34  ;;  %v717_v34 = vld [vmem:[%s2093_s3 + $0x90] sm:$0xff]  ;;  %v1396_v35 = vpack.c.bf16 %v700_v33, %v699_v31  ;;  %v707_v60 = vld [vmem:[%s2093_s3 + $0x40] sm:$0xff]  ;;  %v708_v61 = vld [vmem:[%s2093_s3 + $0x48] sm:$0xff] }
  0x3d   : > { %v734_v0 = vld [vmem:[%s2093_s3 + $0x118] sm:$0xff] }
  0x3e   : > { %1397 = vmatpush3.bf16.msra.mxu1 %v1396_v35 }
  0x3f   : > { %1375 = vmatpush3.bf16.msra.mxu0 %v1374_v39  ;;  %v1398_v39 = vpack.c.bf16 %v718_v36, %v717_v34 }
  0x40   : > { %1377 = vmatprep.subr.bf16.mxu0 %v1376_v40  ;;  %v719_v40 = vld [vmem:[%s2093_s3 + $0xa0] sm:$0xff] }
  0x41   : > { %1399 = vmatprep.subr.bf16.mxu1 %v1398_v39  ;;  %v1402_v43 = vpack.c.bf16 %v720_v41, %v719_v40 }
  0x42   : > { %1401 = vmatpush3.bf16.msra.mxu1 %v1400_v42 }
  0x43   : > { %1379 = vmatpush3.bf16.msra.mxu0 %v1378_v45  ;;  %v704_v45 = vld [vmem:[%s2093_s3 + $0x28] sm:$0xff]  ;;  %1403 = vmatprep.subr.bf16.mxu1 %v1402_v43  ;;  %v936_v43 = vld [vmem:[%s2095_s5] sm:$0xff] }
  0x44   : > { %1381 = vmatprep.subr.bf16.mxu0 %v1380_v46  ;;  %v731_v46 = vld [vmem:[%s2093_s3 + $0x100] sm:$0xff] }
  0x45   : > { %v1427_v50 = vpack.c.bf16 %v732_v49, %v731_v46  ;;  %v941_v49 = vld [vmem:[%s2095_s5 + $0x28] sm:$0xff] }
  0x47   : > { %1383 = vmatpush3.bf16.msra.mxu0 %v1382_v51  ;;  %v1404_v51 = vpack.c.bf16 %v704_v45, %v703_v44  ;;  %v937_v44 = vld [vmem:[%s2095_s5 + $0x8] sm:$0xff]  ;;  %v938_v45 = vld [vmem:[%s2095_s5 + $0x10] sm:$0xff] }
  0x48   : > { %1385 = vmatprep.subr.bf16.mxu0 %v1384_v52  ;;  %v1406_v52 = vpack.c.bf16 %v722_v48, %v721_v47  ;;  %v1439_v46 = vpack.c.bf16 %v937_v44, %v936_v43  ;;  %v939_v47 = vld [vmem:[%s2095_s5 + $0x18] sm:$0xff] }
  0x49   : > { %1405 = vmatpush3.bf16.msra.mxu1 %v1404_v51  ;;  %v1442_v48 = vpack.c.bf16 %v939_v47, %v938_v45  ;;  %v942_v51 = vld [vmem:[%s2095_s5 + $0x30] sm:$0xff] }
  0x4a   : > { %1407 = vmatprep.subr.bf16.mxu1 %v1406_v52  ;;  %v943_v52 = vld [vmem:[%s2095_s5 + $0x38] sm:$0xff] }
  0x4b   : > { %1387 = vmatpush3.bf16.msra.mxu0 %v1386_v55  ;;  %v1408_v55 = vpack.c.bf16 %v706_v54, %v705_v53  ;;  %v1448_v53 = vpack.c.bf16 %v943_v52, %v942_v51  ;;  %v944_v54 = vld [vmem:[%s2095_s5 + $0x40] sm:$0xff] }
  0x4c   : > { %1388 = vmatprep.subr.bf16.mxu0 %v1587_v56 }
  0x4d   : > { %1409 = vmatpush3.bf16.msra.mxu1 %v1408_v55  ;;  %v945_v55 = vld [vmem:[%s2095_s5 + $0x48] sm:$0xff] }
  0x9b   : > { %v405_v57 = vpop.permute.xlu0 %404 }
  0x9c   : > { %v421_v58 = vpop.permute.xlu1 %420  ;;  %408 = vst.msk [vmem:[#allocation2] sm:$0xff] %vm407_vm1, %v405_v57  ;;  %vm674_vm1 = vcmask 1044096  }
  0x9d   : > { %410 = vst.msk [vmem:[#allocation2 + $0x8] sm:$0xff] %vm409_vm2, %v405_v57  ;;  %v723_v57 = vld [vmem:[%s2093_s3 + $0xc0] sm:$0xff]  ;;  %vm675_vm2 = vcmask 261124  }
  0x9e   : > { %426 = vst.msk [vmem:[#allocation2 + $0x10] sm:$0xff] %vm425_vm3, %v421_v58  ;;  %vm676_vm7 = vmor %vm675_vm2, %vm674_vm1  ;;  %vm1029_vm1 = vcmask 122880  }
  0x9f   : > { %v414_v59 = vpop.permute.xlu0 %413 }
  0xa0   : > { %417 = vst.msk [vmem:[#allocation2 + $0x8] sm:$0xff] %vm416_vm4, %v414_v59  ;;  %vm693_vm4 = vcmask 1044352  }
  0xa1   : > { %424 = vst.msk [vmem:[#allocation2 + $0x8] sm:$0xff] %vm423_vm5, %v421_v58  ;;  %v724_v58 = vld [vmem:[%s2093_s3 + $0xc8] sm:$0xff]  ;;  %vm694_vm5 = vcmask 523268  }
  0xa2   : > { %v1410_v59 = vpack.c.bf16 %v724_v58, %v723_v57  ;;  %v1451_v57 = vpack.c.bf16 %v945_v55, %v944_v54 }
  0xa3   : > { %v427_v2 = vld [vmem:[#allocation2] sm:$0xff] }
  0xa4   : > { %1411 = vmatprep.subr.bf16.mxu1 %v1410_v59 }
  0xa5   : > { %v429_v5 = vld [vmem:[#allocation2 + $0x10] sm:$0xff] }
  0xa8   : > { %v428_v63 = vld [vmem:[#allocation2 + $0x8] sm:$0xff] }
  0xa9   : > { %540 = vmatprep.mubr.f32.mxu0 %v428_v63  ;;  %v733_v63 = vld [vmem:[%s2093_s3 + $0x110] sm:$0xff] }
  0xaa   : > { %541 = vmatmul.mubr.f32.vlgmr.msra.gmra.mrb[0].mxu0 %v427_v2  ;;  %v1430_v1 = vpack.c.bf16 %v734_v0, %v733_v63  ;;  %v725_v2 = vld [vmem:[%s2093_s3 + $0xd0] sm:$0xff] }
  0xab   : > { %1390 = vmatpush3.bf16.msra.mxu0 %v1389_v62  ;;  %1299 = vmatprep.mubr.msk.f32.mxu0 %vm1588_vm6, %v1589_v4  ;;  %v1412_v62 = vpack.c.bf16 %v708_v61, %v707_v60  ;;  %v1182_v61 = vld [vmem:[%s2094_s4] ss:$0 sm:$0xff] }
  0xac   : > { %1391 = vmatprep.subr.bf16.mxu0 %v1587_v56 }
  0xad   : > { %1413 = vmatpush3.bf16.msra.mxu1 %v1412_v62 }
  0xaf   : > { %1393 = vmatpush3.bf16.msra.mxu0 %v1392_v3  ;;  %v726_v3 = vld [vmem:[%s2093_s3 + $0xd8] sm:$0xff] }
  0xb0   : > { %1426 = vmatprep.subr.bf16.mxu0 %v1587_v56 }
  0xb2   : > { %1300 = vmatmul.mubr.msk.f32.vlgmr.msra.gmra.mrb[2].mxu0 %vm425_vm3, %v429_v5  ;;  %v1414_v5 = vpack.c.bf16 %v726_v3, %v725_v2  ;;  %vm671_vm3 = vcmask 654336  }
  0xb3   : > { %1318 = vmatprep.mubr.msk.f32.mxu0 %vm1588_vm6, %v1589_v4  ;;  %1428 = vmatpush3.bf16.msra.mxu0 %v1427_v50 }
  0xb4   : > { %1429 = vmatprep.subr.bf16.mxu0 %v1587_v56  ;;  %1415 = vmatprep.subr.bf16.mxu1 %v1414_v5 }
  0xb7   : > { %1431 = vmatpush3.bf16.msra.mxu0 %v1430_v1 }
  0xb8   : > { %1432 = vmatprep.subr.bf16.mxu0 %v1587_v56 }
 0x17d   : > { %v1222_v6 = vpop.f32.mrb[0].mxu0 }
 0x17e   : > { %v1223_v7 = vpop.f32.mrb[1].mxu0 }
 0x17f   : > { %v1224_v8 = vadd.f32 %v1223_v7, %v1222_v6  ;;  %v709_v6 = vld [vmem:[%s2093_s3 + $0x50] sm:$0xff]  ;;  %v710_v7 = vld [vmem:[%s2093_s3 + $0x58] sm:$0xff] }
 0x181   : > { %v543_v10 = vadd.f32 %v1224_v8, %v1179_v9 }
 0x185   : > { %v612_v11 = vpop.f32.mrb[2].mxu0 }
 0x186   : > { %v613_v12 = vadd.f32 %v612_v11, %v543_v10  ;;  %v1301_v13 = vpop.f32.mrb[3].mxu0  ;;  %v1416_v10 = vpack.c.bf16 %v710_v7, %v709_v6  ;;  %v735_v11 = vld [vmem:[%s2093_s3 + $0x120] sm:$0xff]  ;;  %v946_v7 = vld [vmem:[%s2095_s5 + $0x50] sm:$0xff] }
 0x188   : > { %v617_v14 = vmin.f32 %v613_v12, 0.0  ;;  %vm616_vm11 = vcmp.gt.f32.partialorder %v613_v12, 0.0  ;;  %1417 = vmatpush3.bf16.msra.mxu1 %v1416_v10 }
 0x18a   : > { %v618_v15 = vmul.f32 1.442695, %v617_v14  ;;  %v727_v14 = vld [vmem:[%s2093_s3 + $0xe0] sm:$0xff] }
 0x18c   : > { %1514 = vpow2.f32 %v618_v15  ;;  %v728_v15 = vld [vmem:[%s2093_s3 + $0xe8] sm:$0xff] }
 0x196   : > { %v1515_v16 = vpop.eup %1514 }
 0x197   : > { %v1181_v17 = vadd.f32 -1.0, %v1515_v16  ;;  %v711_v16 = vld [vmem:[%s2093_s3 + $0x60] sm:$0xff] }
 0x199   : > { %v621_v18 = vsel %vm616_vm11, %v613_v12, %v1181_v17  ;;  %v736_v12 = vld [vmem:[%s2093_s3 + $0x128] sm:$0xff]  ;;  %v1418_v17 = vpack.c.bf16 %v728_v15, %v727_v14  ;;  %vm695_vm11 = vmor %vm694_vm5, %vm693_vm4 }
 0x19a   : > { %v635_v19 = vrot.slane %v621_v18, 1  ;;  %v637_v20 = vrot.slane %v621_v18, 2  ;;  %v639_v21 = vrot.slane %v621_v18, 3  ;;  %623 = vst.msk [vmem:[%s393_s23] sm:$0xff] %vm622_vm10, %v621_v18  ;;  %v641_v23 = vrot.slane %v621_v18, 4  ;;  %s1591_s23 = smov 80  }
 0x19b   : > { %v1433_v13 = vpack.c.bf16 %v736_v12, %v735_v11  ;;  %1419 = vmatprep.subr.bf16.mxu1 %v1418_v17  ;;  %v949_v14 = vld [vmem:[%s2095_s5 + $0x68] sm:$0xff] }
 0x19c   : > { %v655_v22 = vsel %vm643_vm12, %v621_v18, %v635_v19  ;;  %v644_v24 = vsel %vm643_vm12, %v635_v19, %v637_v20  ;;  %v712_v18 = vld [vmem:[%s2093_s3 + $0x68] sm:$0xff]  ;;  %v737_v19 = vld [vmem:[%s2093_s3 + $0x130] sm:$0xff] }
 0x19d   : > { %v656_v25 = vsel %vm645_vm13, %v655_v22, %v637_v20  ;;  %v646_v26 = vsel %vm645_vm13, %v644_v24, %v639_v21  ;;  %v738_v20 = vld [vmem:[%s2093_s3 + $0x138] sm:$0xff]  ;;  %1434 = vmatpush3.bf16.msra.mxu0 %v1433_v13  ;;  %vm904_vm13 = vcmask 254976   ;;  %v948_v13 = vld [vmem:[%s2095_s5 + $0x60] sm:$0xff] }
 0x19e   : > { %v657_v27 = vsel %vm647_vm14, %v656_v25, %v639_v21  ;;  %v648_v28 = vsel %vm647_vm14, %v646_v26, %v641_v23  ;;  %v1420_v21 = vpack.c.bf16 %v712_v18, %v711_v16  ;;  %v1436_v22 = vpack.c.bf16 %v738_v20, %v737_v19  ;;  %v729_v23 = vld [vmem:[%s2093_s3 + $0xf0] sm:$0xff]  ;;  %v730_v24 = vld [vmem:[%s2093_s3 + $0xf8] sm:$0xff]  ;;  %1435 = vmatprep.subr.bf16.mxu0 %v1587_v56 }
 0x19f   : > { %659 = vrot.lane.b32.xlu1 %v657_v27, %s1590_s0  ;;  %650 = vrot.lane.b32.xlu0 %v648_v28, %s1590_s0  ;;  %v713_v25 = vld [vmem:[%s2093_s3 + $0x70] sm:$0xff]  ;;  %v1422_v26 = vpack.c.bf16 %v730_v24, %v729_v23  ;;  %v714_v27 = vld [vmem:[%s2093_s3 + $0x78] sm:$0xff]  ;;  %v1457_v17 = vpack.c.bf16 %v949_v14, %v948_v13  ;;  %vm912_vm14 = vcmask 253952   ;;  %s1595_s0 = smov 96  }
 0x1a0   : > { %1421 = vmatpush3.bf16.msra.mxu1 %v1420_v21  ;;  %v1424_v28 = vpack.c.bf16 %v714_v27, %v713_v25  ;;  %v950_v18 = vld [vmem:[%s2095_s5 + $0x70] sm:$0xff]  ;;  %v951_v19 = vld [vmem:[%s2095_s5 + $0x78] sm:$0xff] }
 0x1a1   : > { %1437 = vmatpush3.bf16.msra.mxu0 %v1436_v22  ;;  %1423 = vmatprep.subr.bf16.mxu1 %v1422_v26  ;;  %v1460_v20 = vpack.c.bf16 %v951_v19, %v950_v18 }
 0x1a4   : > { %1425 = vmatpush3.bf16.msra.mxu1 %v1424_v28  ;;  %v952_v28 = vld [vmem:[%s2096_s6] sm:$0x1] }
 0x1a5   : > { %1438 = vmatprep.subr.bf16.mxu1 %v1587_v56 }
 0x211   : > { %v660_v8 = vpop.permute.xlu1 %659  ;;  %v651_v9 = vpop.permute.xlu0 %650 }
 0x212   : > { %662 = vst.msk [vmem:[#allocation5 + $0x8] sm:$0xf] %vm653_vm15, %v660_v8  ;;  %654 = vst.msk [vmem:[#allocation5 + $0x1] sm:$0xf] %vm653_vm15, %v651_v9  ;;  %v947_v8 = vld [vmem:[%s2095_s5 + $0x58] sm:$0xff]  ;;  %vm926_vm15 = vcmask 778752  }
 0x213   : > { %v1454_v9 = vpack.c.bf16 %v947_v8, %v946_v7 }
 0x219   : > { %v666_v29 = vld [vmem:[#allocation5 + $0x8] sm:$0xf]  ;;  %v663_v31 = vld [vmem:[#allocation5] sm:$0xf] }
 0x21a   : > { %v685_v30 = vld [vmem:[#allocation5 + $0x9] sm:$0xf]  ;;  %668 = vrot.lane.b32.xlu1 %v666_v29, %s1591_s23  ;;  %665 = vst.msk [vmem:[#allocation3] sm:$0xf] %vm664_vm0, %v663_v31  ;;  %v678_v32 = vld [vmem:[#allocation5 + $0x1] sm:$0xf] }
 0x21b   : > { %687 = vrot.lane.b32.xlu0 %v685_v30, %s1592_s16  ;;  %vm933_vm0 = vcmask 1041152  }
 0x21e   : > { %680 = vrot.lane.b32.xlu1 %v678_v32, %s1593_s17 }
 0x28c   : > { %v669_v33 = vpop.permute.xlu1 %668 }
 0x28d   : > { %v688_v34 = vpop.permute.xlu0 %687  ;;  %v670_v35 = vrot.slane %v669_v33, 4 }
 0x28e   : > { %v689_v36 = vrot.slane %v688_v34, 4 }
 0x28f   : > { %v672_v37 = vsel %vm671_vm3, %v670_v35, %v669_v33 }
 0x290   : > { %v681_v38 = vpop.permute.xlu1 %680  ;;  %677 = vst.msk [vmem:[#allocation3] sm:$0xff] %vm676_vm7, %v672_v37  ;;  %v691_v39 = vsel %vm690_vm8, %v689_v36, %v688_v34 }
 0x291   : > { %684 = vst.msk [vmem:[#allocation3 + $0x4] sm:$0xf] %vm683_vm9, %v681_v38 }
 0x292   : > { %696 = vst.msk [vmem:[#allocation3 + $0x4] sm:$0xff] %vm695_vm11, %v691_v39 }
 0x299   : > { %v698_v40 = vld [vmem:[#allocation3 + $0x8] sm:$0xf]  ;;  %v697_v41 = vld [vmem:[#allocation3] sm:$0xff] }
 0x29a   : > { %1319 = vmatmul.mubr.msk.f32.vlgmr.msra.gmra.mrb[4].mxu0 %vm622_vm10, %v698_v40  ;;  %v748_v42 = vcombine.high %v697_v41, %v697_v41 }
 0x29c   : > { %816 = vmatprep.mubr.f32.mxu1 %v748_v42 }
 0x29d   : > { %817 = vmatmul.mubr.f32.vlgmr.msra.gmra.mrb[0].mxu1 %v697_v41 }
 0x29e   : > { %1353 = vmatprep.mubr.msk.f32.mxu1 %vm1588_vm6, %v1589_v4  ;;  %1440 = vmatpush3.bf16.msra.mxu1 %v1439_v46  ;;  %v940_v4 = vld [vmem:[%s2095_s5 + $0x20] sm:$0xff]  ;;  %vm898_vm6 = vcmask 257024  }
 0x29f   : > { %1441 = vmatprep.subr.bf16.mxu1 %v1587_v56  ;;  %v1445_v50 = vpack.c.bf16 %v941_v49, %v940_v4 }
 0x2a2   : > { %1443 = vmatpush3.bf16.msra.mxu1 %v1442_v48 }
 0x2a3   : > { %1444 = vmatprep.subr.bf16.mxu1 %v1587_v56 }
 0x2a6   : > { %1446 = vmatpush3.bf16.msra.mxu1 %v1445_v50 }
 0x2a7   : > { %1447 = vmatprep.subr.bf16.mxu1 %v1587_v56 }
 0x2aa   : > { %1449 = vmatpush3.bf16.msra.mxu1 %v1448_v53 }
 0x2ab   : > { %1450 = vmatprep.subr.bf16.mxu1 %v1587_v56 }
 0x2ae   : > { %1452 = vmatpush3.bf16.msra.mxu1 %v1451_v57 }
 0x2af   : > { %1453 = vmatprep.subr.bf16.mxu1 %v1587_v56 }
 0x2b2   : > { %1455 = vmatpush3.bf16.msra.mxu1 %v1454_v9 }
 0x2b3   : > { %1456 = vmatprep.subr.bf16.mxu1 %v1587_v56 }
 0x2b6   : > { %1458 = vmatpush3.bf16.msra.mxu1 %v1457_v17 }
 0x2b7   : > { %1459 = vmatprep.subr.bf16.mxu1 %v1587_v56 }
 0x2ba   : > { %1461 = vmatpush3.bf16.msra.mxu1 %v1460_v20 }
 0x36d   : > { %v888_v58 = vpop.f32.mrb[4].mxu0 }
 0x36e   : > { %v1320_v59 = vpop.f32.mrb[5].mxu0 }
 0x370   : > { %v1262_v60 = vpop.f32.mrb[0].mxu1 }
 0x371   : > { %v1263_v62 = vpop.f32.mrb[1].mxu1 }
 0x372   : > { %v1264_v63 = vadd.f32 %v1263_v62, %v1262_v60 }
 0x374   : > { %v819_v0 = vadd.f32 %v1264_v63, %v1182_v61 }
 0x376   : > { %v889_v1 = vadd.f32 %v888_v58, %v819_v0 }
 0x378   : > { %v893_v2 = vmin.f32 %v889_v1, 0.0  ;;  %vm892_vm10 = vcmp.gt.f32.partialorder %v889_v1, 0.0 }
 0x37a   : > { %v894_v3 = vmul.f32 1.442695, %v893_v2 }
 0x37c   : > { %1516 = vpow2.f32 %v894_v3 }
 0x386   : > { %v1517_v5 = vpop.eup %1516 }
 0x387   : > { %v1184_v6 = vadd.f32 -1.0, %v1517_v5 }
 0x389   : > { %v897_v10 = vsel %vm892_vm10, %v889_v1, %v1184_v6 }
 0x38a   : > { %899 = vst.msk [vmem:[%s397_s25] sm:$0xf] %vm898_vm6, %v897_v10  ;;  %v901_v11 = vrot.slane %v897_v10, 1  ;;  %v906_v12 = vrot.slane %v897_v10, 2  ;;  %s1524_s25 = sshll.u32 %s1596_s22, 4  ;;  %s1525_s25 = int_to_ptr.vmem [resolvable:$false] %s1524_s25 }
 0x38b   : > { %p1527_p3 = scmp.lt.s32.totalorder %s2048_s14, %s1525_s25 }
 0x38c   : > { %v903_v15 = vsel %vm643_vm12, %v897_v10, %v901_v11  ;;  %v908_v16 = vsel %vm643_vm12, %v901_v11, %v906_v12  ;;  %vm919_vm12 = vcmask 516352  }
 0x38d   : > { %905 = vst.msk [vmem:[#allocation6] sm:$0x3] %vm904_vm13, %v903_v15  ;;  %910 = vst.msk [vmem:[#allocation6 + $0x2] sm:$0x3] %vm904_vm13, %v908_v16 }
 0x394   : > { %v914_v21 = vld [vmem:[#allocation6 + $0x2] sm:$0x1]  ;;  %v921_v22 = vld [vmem:[#allocation6 + $0x1] sm:$0x1]  ;;  %v911_v23 = vld [vmem:[#allocation6] sm:$0x1] }
 0x395   : > { %916 = vrot.lane.b32.xlu0 %v914_v21, %s1593_s17  ;;  %923 = vrot.lane.b32.xlu1 %v921_v22, %s1594_s24  ;;  %913 = vst.msk [vmem:[#allocation4] sm:$0x1] %vm912_vm14, %v911_v23  ;;  %v928_v24 = vld [vmem:[#allocation6 + $0x3] sm:$0x1]  ;;  %s1526_s24 = scalar_lea.vmem %s1525_s25, 32 }
 0x396   : > { %p1528_p4 = scmp.lt.s32.totalorder %s1526_s24, %s1520_s13 }
 0x398   : > { %p1529_p5 = por %p1528_p4, %p1527_p3 }
 0x399   : > { %930 = vrot.lane.b32.xlu0 %v928_v24, %s1595_s0 }
 0x39a   : > { %p1530_p7 = pnand %p1529_p5, %p1523_p2 }
 0x407   : > { %v917_v25 = vpop.permute.xlu0 %916  ;;  %v924_v26 = vpop.permute.xlu1 %923 }
 0x408   : > { %920 = vst.msk [vmem:[#allocation4] sm:$0x1] %vm919_vm12, %v917_v25 }
 0x409   : > { %927 = vst.msk [vmem:[#allocation4] sm:$0x1] %vm926_vm15, %v924_v26 }
 0x40b   : > { %v931_v56 = vpop.permute.xlu0 %930 }
 0x40c   : > { %934 = vst.msk [vmem:[#allocation4] sm:$0x1] %vm933_vm0, %v931_v56 }
 0x413   : > { %v935_v27 = vld [vmem:[#allocation4] sm:$0x1] }
 0x414   : > { %1354 = vmatmul.mubr.f32.vlgmr.msra.gmra.mrb[2].mxu1 %v935_v27 }
 0x4e7   : > { %v1019_v29 = vpop.f32.mrb[2].mxu1 }
 0x4e8   : > { %v1020_v30 = vadd.f32 %v1019_v29, %v952_v28  ;;  %v1355_v31 = vpop.f32.mrb[3].mxu1 }
 0x4ea   : > { %v1024_v32 = vmin.f32 %v1020_v30, 0.0  ;;  %vm1023_vm2 = vcmp.gt.f32.partialorder %v1020_v30, 0.0 }
 0x4ec   : > { %v1025_v33 = vmul.f32 1.442695, %v1024_v32 }
 0x4ee   : > { %1518 = vpow2.f32 %v1025_v33 }
 0x4f8   : > { %v1519_v34 = vpop.eup %1518 }
 0x4f9   : > { %v1185_v35 = vadd.f32 -1.0, %v1519_v34 }
 0x4fb   : > { %v1028_v36 = vsel %vm1023_vm2, %v1020_v30, %v1185_v35 }
 0x4fc   : > { %1030 = vst.msk [vmem:[%s389_s26] sm:$0x1] %vm1029_vm1, %v1028_v36 }
 0x4fd   : > { %1533 = shalt.err (!%p1530_p7)
}
 0x4fe   : > { %s1534_s28 = scalar_lea.hbm %s2046_s21, 16  ;;  %s1538_s27 = scalar_lea.hbm %s2099_s9, 32 }
 0x4ff   : > { %p1535_p10 = scmp.ne.s32.totalorder %s2046_s21, %s1534_s28  ;;  %p1539_p13 = scmp.lt.u32.totalorder %s2046_s21, %s2099_s9 }
 0x500   : > { %p1540_p0 = scmp.lt.u32.totalorder %s1538_s27, %s1534_s28  ;;  %p1542_p2 = scmp.lt.u32.totalorder %s1534_s28, %s2046_s21 }
 0x501   : > { %p1536_p11 = pnand %p1535_p10, %p1686_p6 }
 0x502   : > { %p1541_p1 = por %p1540_p0, %p1539_p13 }
 0x503   : > { %p1537_p12 = pneg %p1536_p11 }
 0x504   : > { %p1543_p3 = por %p1542_p2, %p1541_p1 }
 0x506   : > { %p1544_p4 = pnand %p1543_p3, %p1537_p12 }
 0x508   : > { %1547 = shalt.err (!%p1544_p4)
}
 0x509   : > { %1462 = dma.vmem_to_hbm [thread:$0]  (%p1686_p6), %s2048_s14, 16, %s2046_s21, %s1040_s1  }
 0x50a PF: > { %s1084_s23 = sand.u32 1, %s1570_s30   ;;  %p1465_p5 = pnand %p1169_p9, %p1690_p8 }
 0x50b   : > { %s1085_s16 = scalar_lea.sflag [#allocation9], %s1084_s23 }
 0x50c   : > { %1565 = dma.done.wait (!%p1465_p5), %s1085_s16, 16  }
 0x50d   : > { %1567 = vsyncadd (!%p1465_p5), %s1085_s16, 4294967280  ;;  %p20_p7 = scmp.ge.s32.totalorder %s1672_s15, 4   ;;  %s2106_s30 = smov %s1574_s10 }
 0x50e   : > { %s2107_s10 = smov %s1578_s11  ;;  %s2108_s11 = smov %s1684_s18 }
 0x50f   : > { %s2109_s12 = smov %s1672_s15  ;;  %22 = sbr.rel (!%p20_p7) target bundleno = 6 (0x6), region = 153 }
 0x516   :  { %1089 = vsyncpa [#allocation9], 1 }
 0x517   :  { %1091 = vsyncpa [#allocation9 + $0x1], 1 }

</bundles_post_ra>
